<compile_context>
chip_gen: v5e
topology: v5e:2x2
jax: 0.10.0
libtpu: 0.0.40
codegen_flags: <defaults>
</compile_context>

<pallas_src>
import math

import jax
import jax.numpy as jnp
import numpy as np
from jax import lax
from jax.experimental import pallas as pl
from jax.experimental.pallas import tpu as pltpu


# Static architecture of the PyTorch module: (Cin, Cout, padding) per layer,
# kernel 2x2, stride 1, SiLU after every layer except the last.
LAYER_DEFS = ((3, 4, 0), (4, 5, 1), (5, 8, 0), (8, 8, 1), (8, 16, 1))
KSIZE = 2
N_BATCH = 2
H_IN = 8          # 8x8 spatial input (square throughout)


def _geometry():
    """Static per-layer shapes for the fused kernel (square spatial dims)."""
    geo = []
    h = H_IN
    for li, (cin, cout, pad) in enumerate(LAYER_DEFS):
        pe = KSIZE - 1 - pad                        # effective zero padding
        hp = h + 2 * pe                             # padded input extent
        ho = hp - KSIZE + 1                         # output extent
        pe_next = (KSIZE - 1 - LAYER_DEFS[li + 1][2]) if li + 1 < len(LAYER_DEFS) else 0
        wcols = ho + 2 * pe_next                    # W extent of the consumer slab
        geo.append(dict(cin=cin, cout=cout, pe=pe, h_in=h, hp=hp, ho=ho,
                        pe_next=pe_next, wcols=wcols,
                        k_in=hp * N_BATCH * cin,        # slab lane width
                        k_out=wcols * N_BATCH * cout))  # matmul output width
        h = ho
    return geo


GEO = _geometry()
SLAB_SHAPES = tuple((g["hp"], g["k_in"]) for g in GEO)


def _fused_kernel(x_ref, *refs):
    """All 5 ConvTranspose2d(k=2,s=1) [+ SiLU] layers fused in one kernel.

    refs = (rhs1_d0, rhs1_d1, brow1, ..., rhs5_d0, rhs5_d1, brow5,
            o_ref, slab1..slab5).

    Activations are carried lane-dense as (H, W*N*C) VMEM slabs.  Each layer
    is two banded matmuls (one per kernel row di) whose LHS is a static
    row-slice view of the padded slab ref; W padding and bias live inside the
    precomputed banded weights, H padding is two zeroed border rows.
    """
    n_layers = len(LAYER_DEFS)
    wrefs = refs[:3 * n_layers]
    o_ref = refs[3 * n_layers]
    slabs = refs[3 * n_layers + 1:]

    # --- Stage the NCHW input into slab 0 (lanes ordered (n, c, w), zero-padded).
    g0 = GEO[0]
    s0 = slabs[0]
    cin0, wp0, pe0 = g0["cin"], g0["hp"], g0["pe"]
    s0[...] = jnp.zeros(s0.shape, s0.dtype)          # tiny (10, 60) slab: 2 stores
    for n in range(N_BATCH):
        for c in range(cin0):
            base = (n * cin0 + c) * wp0 + pe0
            s0[pe0:pe0 + H_IN, base:base + H_IN] = x_ref[n, c, :, :]

    # --- 5 fused layers: 2 banded MXU matmuls each (+bias, +SiLU except last).
    for li, g in enumerate(GEO):
        rhs0, rhs1, brow = wrefs[3 * li], wrefs[3 * li + 1], wrefs[3 * li + 2]
        s_in = slabs[li]
        ho = g["ho"]
        y = (jnp.dot(s_in[0:ho, :], rhs0[...], preferred_element_type=jnp.float32)
             + jnp.dot(s_in[1:1 + ho, :], rhs1[...], preferred_element_type=jnp.float32)
             + brow[...])
        if li + 1 < n_layers:
            y = y * jax.nn.sigmoid(y)                # SiLU (exact 0 stays 0 at pad cols)
            s_next = slabs[li + 1]
            pe_n = g["pe_next"]
            if pe_n:
                # Border-row-only zeroing; W-pad columns of y are already exact zeros.
                zrow = jnp.zeros((pe_n, y.shape[1]), s_next.dtype)
                s_next[0:pe_n, :] = zrow
                s_next[pe_n + ho:pe_n + ho + pe_n, :] = zrow
                s_next[pe_n:pe_n + ho, :] = y
            else:
                s_next[...] = y
        else:
            o_ref[...] = y.astype(o_ref.dtype)       # lane-dense (7, 224)


def make_params(key):
    """Deterministic ConvTranspose2d params in the PyTorch layout (Cin,Cout,k,k)."""
    params = []
    for i, (cin, cout, _pad) in enumerate(LAYER_DEFS):
        kw_, kb_ = jax.random.split(jax.random.fold_in(key, i))
        bound = 1.0 / math.sqrt(cin * KSIZE * KSIZE)
        w = jax.random.uniform(kw_, (cin, cout, KSIZE, KSIZE), jnp.float32,
                               -bound, bound)
        b = jax.random.uniform(kb_, (cout,), jnp.float32, -bound, bound)
        params.append((w, b))
    return params


def prep_params(params):
    """One-time weight prep (hoisted off the per-forward path).

    ConvTranspose2d(k=2, s=1, pad=p) == VALID 2x2 conv over an input padded by
    pe = k-1-p with the spatially flipped weight.  In the lane-dense
    (H, W*N*C) layout this becomes, per kernel row di, one banded matmul
    (Hp, Wp*N*Cin) @ (Wp*N*Cin, Wcols*N*Cout) where:
      - the W taps (dj) and channel contraction live in the band,
      - the consumer layer's W zero padding is folded in as zero columns,
      - the bias becomes a (1, Wcols*N*Cout) row (zero at the pad columns).
    Layer 1's input lanes are ordered (n, c, w) so the kernel can stage the
    NCHW input with contiguous plane stores; later layers use (w, n, c).
    """
    prepped = []
    for li, (g, (w_ct, b)) in enumerate(zip(GEO, params)):
        cin, cout = g["cin"], g["cout"]
        wp, wo, pe_n = g["hp"], g["ho"], g["pe_next"]
        # ConvTranspose2d weight -> forward-conv weight (kh, kw, Cin, Cout).
        w_conv = np.asarray(jnp.flip(w_ct, axis=(2, 3)).transpose(2, 3, 0, 1))
        b_np = np.asarray(b)

        def in_lane(w, n, c, _li=li, _cin=cin, _wp=wp):
            if _li == 0:                              # (n, c, w): matches in-kernel staging
                return (n * _cin + c) * _wp + w
            return (w * N_BATCH + n) * _cin + c       # (w, n, c)

        rhs = np.zeros((KSIZE, g["k_in"], g["k_out"]), np.float32)
        brow = np.zeros((1, g["k_out"]), np.float32)
        for w_out in range(wo):
            for n in range(N_BATCH):
                col0 = ((w_out + pe_n) * N_BATCH + n) * cout
                brow[0, col0:col0 + cout] = b_np
                for dj in range(KSIZE):
                    w_in = w_out + dj
                    for c in range(cin):
                        for di in range(KSIZE):
                            rhs[di, in_lane(w_in, n, c), col0:col0 + cout] = \
                                w_conv[di, dj, c]
        prepped.extend([jnp.asarray(rhs[0]), jnp.asarray(rhs[1]),
                        jnp.asarray(brow)])
    return prepped


@jax.jit
def model_forward(x_nchw, prepped):
    g = GEO[-1]
    ho, cout = g["ho"], g["cout"]
    out2d = pl.pallas_call(
        _fused_kernel,
        out_shape=jax.ShapeDtypeStruct((ho, g["k_out"]), jnp.float32),
        in_specs=[pl.BlockSpec(memory_space=pltpu.MemorySpace.VMEM)] * (1 + len(prepped)),
        out_specs=pl.BlockSpec(memory_space=pltpu.MemorySpace.VMEM),
        scratch_shapes=[pltpu.VMEM(s, jnp.float32) for s in SLAB_SHAPES],
    )(x_nchw, *prepped)
    # Output lanes are ordered (w, n, cout); one tiny reshape+transpose -> NCHW.
    return out2d.reshape(ho, ho, N_BATCH, cout).transpose(2, 3, 0, 1)


# ----------------------- pure-JAX reference (unchanged) -----------------------
def _ref_layer(x_nhwc, w_ct, b, pad, apply_silu):
    pe = KSIZE - 1 - pad
    xp = jnp.pad(x_nhwc, ((0, 0), (pe, pe), (pe, pe), (0, 0)))
    w_conv = jnp.flip(w_ct, axis=(2, 3)).transpose(2, 3, 0, 1)
    y = lax.conv_general_dilated(
        xp, w_conv, window_strides=(1, 1), padding="VALID",
        dimension_numbers=("NHWC", "HWIO", "NHWC"))
    y = y + b
    if apply_silu:
        y = y * jax.nn.sigmoid(y)
    return y


def model_forward_ref(x_nchw, params):
    x = jnp.transpose(x_nchw, (0, 2, 3, 1))
    n = len(params)
    for i, ((_cin, _cout, pad), (w_ct, b)) in enumerate(zip(LAYER_DEFS, params)):
        x = _ref_layer(x, w_ct, b, pad, i < n - 1)
    return jnp.transpose(x, (0, 3, 1, 2))


if __name__ == "__main__":
    key = jax.random.PRNGKey(0)
    kx, kp = jax.random.split(key)

    x1 = jax.random.normal(kx, (N_BATCH, LAYER_DEFS[0][0], H_IN, H_IN),
                           jnp.float32)                 # torch.randn(2, 3, 8, 8)
    params = make_params(kp)
    prepped = prep_params(params)   # one-time banded-weight prep (off the hot path)

    out = jax.block_until_ready(model_forward(x1, prepped))
    ref = jax.block_until_ready(model_forward_ref(x1, params))

    assert out.shape == (2, 16, 7, 7), out.shape
    np.testing.assert_allclose(np.asarray(out), np.asarray(ref),
                               rtol=2e-4, atol=2e-4)

    print("KERNEL_OK")
</pallas_src>

<mosaic_0001>
module attributes {stable_mosaic.version = 11 : i64} {
  func.func @_fused_kernel(%arg0: memref<2x3x8x8xf32, #tpu.memory_space<vmem>>, %arg1: memref<60x72xf32, #tpu.memory_space<vmem>>, %arg2: memref<60x72xf32, #tpu.memory_space<vmem>>, %arg3: memref<1x72xf32, #tpu.memory_space<vmem>>, %arg4: memref<72x100xf32, #tpu.memory_space<vmem>>, %arg5: memref<72x100xf32, #tpu.memory_space<vmem>>, %arg6: memref<1x100xf32, #tpu.memory_space<vmem>>, %arg7: memref<100x144xf32, #tpu.memory_space<vmem>>, %arg8: memref<100x144xf32, #tpu.memory_space<vmem>>, %arg9: memref<1x144xf32, #tpu.memory_space<vmem>>, %arg10: memref<144x128xf32, #tpu.memory_space<vmem>>, %arg11: memref<144x128xf32, #tpu.memory_space<vmem>>, %arg12: memref<1x128xf32, #tpu.memory_space<vmem>>, %arg13: memref<128x224xf32, #tpu.memory_space<vmem>>, %arg14: memref<128x224xf32, #tpu.memory_space<vmem>>, %arg15: memref<1x224xf32, #tpu.memory_space<vmem>>, %arg16: memref<7x224xf32, #tpu.memory_space<vmem>>, %arg17: memref<10x60xf32, #tpu.memory_space<vmem>>, %arg18: memref<9x72xf32, #tpu.memory_space<vmem>>, %arg19: memref<10x100xf32, #tpu.memory_space<vmem>>, %arg20: memref<9x144xf32, #tpu.memory_space<vmem>>, %arg21: memref<8x128xf32, #tpu.memory_space<vmem>>) attributes {dimension_semantics = [], scalar_prefetch = 0 : i64, scratch_operands = 5 : i64, tpu.core_type = #tpu.core_type<tc>} {
    %cst = arith.constant 0.000000e+00 : f32
    %0 = vector.broadcast %cst : f32 to vector<10x60xf32>
    %c0 = arith.constant 0 : index
    %c0_0 = arith.constant 0 : index
    %1 = vector.load %arg17[%c0, %c0_0] : memref<10x60xf32, #tpu.memory_space<vmem>>, vector<10x60xf32>
    tpu.vector_store %arg17[%c0, %c0_0], %0 {strides = array<i32>} : memref<10x60xf32, #tpu.memory_space<vmem>>, vector<10x60xf32>,
    %c0_1 = arith.constant 0 : index
    %c0_2 = arith.constant 0 : index
    %c0_3 = arith.constant 0 : index
    %c0_4 = arith.constant 0 : index
    %2 = vector.load %arg0[%c0_1, %c0_2, %c0_3, %c0_4] : memref<2x3x8x8xf32, #tpu.memory_space<vmem>>, vector<1x1x8x8xf32>
    %3 = vector.shape_cast %2 : vector<1x1x8x8xf32> to vector<8x8xf32>
    %c1 = arith.constant 1 : index
    %c1_5 = arith.constant 1 : index
    %4 = vector.load %arg17[%c1, %c1_5] : memref<10x60xf32, #tpu.memory_space<vmem>>, vector<8x8xf32>
    tpu.vector_store %arg17[%c1, %c1_5], %3 {strides = array<i32>} : memref<10x60xf32, #tpu.memory_space<vmem>>, vector<8x8xf32>,
    %c0_6 = arith.constant 0 : index
    %c1_7 = arith.constant 1 : index
    %c0_8 = arith.constant 0 : index
    %c0_9 = arith.constant 0 : index
    %5 = vector.load %arg0[%c0_6, %c1_7, %c0_8, %c0_9] : memref<2x3x8x8xf32, #tpu.memory_space<vmem>>, vector<1x1x8x8xf32>
    %6 = vector.shape_cast %5 : vector<1x1x8x8xf32> to vector<8x8xf32>
    %c1_10 = arith.constant 1 : index
    %c11 = arith.constant 11 : index
    %7 = vector.load %arg17[%c1_10, %c11] : memref<10x60xf32, #tpu.memory_space<vmem>>, vector<8x8xf32>
    tpu.vector_store %arg17[%c1_10, %c11], %6 {strides = array<i32>} : memref<10x60xf32, #tpu.memory_space<vmem>>, vector<8x8xf32>,
    %c0_11 = arith.constant 0 : index
    %c2 = arith.constant 2 : index
    %c0_12 = arith.constant 0 : index
    %c0_13 = arith.constant 0 : index
    %8 = vector.load %arg0[%c0_11, %c2, %c0_12, %c0_13] : memref<2x3x8x8xf32, #tpu.memory_space<vmem>>, vector<1x1x8x8xf32>
    %9 = vector.shape_cast %8 : vector<1x1x8x8xf32> to vector<8x8xf32>
    %c1_14 = arith.constant 1 : index
    %c21 = arith.constant 21 : index
    %10 = vector.load %arg17[%c1_14, %c21] : memref<10x60xf32, #tpu.memory_space<vmem>>, vector<8x8xf32>
    tpu.vector_store %arg17[%c1_14, %c21], %9 {strides = array<i32>} : memref<10x60xf32, #tpu.memory_space<vmem>>, vector<8x8xf32>,
    %c1_15 = arith.constant 1 : index
    %c0_16 = arith.constant 0 : index
    %c0_17 = arith.constant 0 : index
    %c0_18 = arith.constant 0 : index
    %11 = vector.load %arg0[%c1_15, %c0_16, %c0_17, %c0_18] : memref<2x3x8x8xf32, #tpu.memory_space<vmem>>, vector<1x1x8x8xf32>
    %12 = vector.shape_cast %11 : vector<1x1x8x8xf32> to vector<8x8xf32>
    %c1_19 = arith.constant 1 : index
    %c31 = arith.constant 31 : index
    %13 = vector.load %arg17[%c1_19, %c31] : memref<10x60xf32, #tpu.memory_space<vmem>>, vector<8x8xf32>
    tpu.vector_store %arg17[%c1_19, %c31], %12 {strides = array<i32>} : memref<10x60xf32, #tpu.memory_space<vmem>>, vector<8x8xf32>,
    %c1_20 = arith.constant 1 : index
    %c1_21 = arith.constant 1 : index
    %c0_22 = arith.constant 0 : index
    %c0_23 = arith.constant 0 : index
    %14 = vector.load %arg0[%c1_20, %c1_21, %c0_22, %c0_23] : memref<2x3x8x8xf32, #tpu.memory_space<vmem>>, vector<1x1x8x8xf32>
    %15 = vector.shape_cast %14 : vector<1x1x8x8xf32> to vector<8x8xf32>
    %c1_24 = arith.constant 1 : index
    %c41 = arith.constant 41 : index
    %16 = vector.load %arg17[%c1_24, %c41] : memref<10x60xf32, #tpu.memory_space<vmem>>, vector<8x8xf32>
    tpu.vector_store %arg17[%c1_24, %c41], %15 {strides = array<i32>} : memref<10x60xf32, #tpu.memory_space<vmem>>, vector<8x8xf32>,
    %c1_25 = arith.constant 1 : index
    %c2_26 = arith.constant 2 : index
    %c0_27 = arith.constant 0 : index
    %c0_28 = arith.constant 0 : index
    %17 = vector.load %arg0[%c1_25, %c2_26, %c0_27, %c0_28] : memref<2x3x8x8xf32, #tpu.memory_space<vmem>>, vector<1x1x8x8xf32>
    %18 = vector.shape_cast %17 : vector<1x1x8x8xf32> to vector<8x8xf32>
    %c1_29 = arith.constant 1 : index
    %c51 = arith.constant 51 : index
    %19 = vector.load %arg17[%c1_29, %c51] : memref<10x60xf32, #tpu.memory_space<vmem>>, vector<8x8xf32>
    tpu.vector_store %arg17[%c1_29, %c51], %18 {strides = array<i32>} : memref<10x60xf32, #tpu.memory_space<vmem>>, vector<8x8xf32>,
    %c0_30 = arith.constant 0 : index
    %c0_31 = arith.constant 0 : index
    %20 = vector.load %arg17[%c0_30, %c0_31] : memref<10x60xf32, #tpu.memory_space<vmem>>, vector<9x60xf32>
    %c0_32 = arith.constant 0 : index
    %c0_33 = arith.constant 0 : index
    %21 = vector.load %arg1[%c0_32, %c0_33] : memref<60x72xf32, #tpu.memory_space<vmem>>, vector<60x72xf32>
    %cst_34 = arith.constant dense<0.000000e+00> : vector<9x72xf32>
    %22 = tpu.matmul %20, %21, %cst_34 {dimension_numbers = #tpu.dot_dimension_numbers<[1], [0], [0], [1], [0, 0, 1, 1], [], []>} : vector<9x60xf32>, vector<60x72xf32>, vector<9x72xf32> -> vector<9x72xf32>
    %c1_35 = arith.constant 1 : index
    %c0_36 = arith.constant 0 : index
    %23 = vector.load %arg17[%c1_35, %c0_36] : memref<10x60xf32, #tpu.memory_space<vmem>>, vector<9x60xf32>
    %c0_37 = arith.constant 0 : index
    %c0_38 = arith.constant 0 : index
    %24 = vector.load %arg2[%c0_37, %c0_38] : memref<60x72xf32, #tpu.memory_space<vmem>>, vector<60x72xf32>
    %cst_39 = arith.constant dense<0.000000e+00> : vector<9x72xf32>
    %25 = tpu.matmul %23, %24, %cst_39 {dimension_numbers = #tpu.dot_dimension_numbers<[1], [0], [0], [1], [0, 0, 1, 1], [], []>} : vector<9x60xf32>, vector<60x72xf32>, vector<9x72xf32> -> vector<9x72xf32>
    %26 = arith.addf %22, %25 : vector<9x72xf32>
    %c0_40 = arith.constant 0 : index
    %c0_41 = arith.constant 0 : index
    %27 = vector.load %arg3[%c0_40, %c0_41] : memref<1x72xf32, #tpu.memory_space<vmem>>, vector<1x72xf32>
    %28 = vector.broadcast %27 : vector<1x72xf32> to vector<9x72xf32>
    %29 = arith.addf %26, %28 : vector<9x72xf32>
    %30 = arith.negf %29 : vector<9x72xf32>
    %31 = math.exp %30 : vector<9x72xf32>
    %cst_42 = arith.constant 1.000000e+00 : f32
    %32 = vector.broadcast %cst_42 : f32 to vector<9x72xf32>
    %33 = arith.addf %32, %31 : vector<9x72xf32>
    %34 = arith.divf %32, %33 : vector<9x72xf32>
    %35 = arith.mulf %29, %34 : vector<9x72xf32>
    %c0_43 = arith.constant 0 : index
    %c0_44 = arith.constant 0 : index
    %36 = vector.load %arg18[%c0_43, %c0_44] : memref<9x72xf32, #tpu.memory_space<vmem>>, vector<9x72xf32>
    tpu.vector_store %arg18[%c0_43, %c0_44], %35 {strides = array<i32>} : memref<9x72xf32, #tpu.memory_space<vmem>>, vector<9x72xf32>,
    %c0_45 = arith.constant 0 : index
    %c0_46 = arith.constant 0 : index
    %37 = vector.load %arg18[%c0_45, %c0_46] : memref<9x72xf32, #tpu.memory_space<vmem>>, vector<8x72xf32>
    %c0_47 = arith.constant 0 : index
    %c0_48 = arith.constant 0 : index
    %38 = vector.load %arg4[%c0_47, %c0_48] : memref<72x100xf32, #tpu.memory_space<vmem>>, vector<72x100xf32>
    %cst_49 = arith.constant dense<0.000000e+00> : vector<8x100xf32>
    %39 = tpu.matmul %37, %38, %cst_49 {dimension_numbers = #tpu.dot_dimension_numbers<[1], [0], [0], [1], [0, 0, 1, 1], [], []>} : vector<8x72xf32>, vector<72x100xf32>, vector<8x100xf32> -> vector<8x100xf32>
    %c1_50 = arith.constant 1 : index
    %c0_51 = arith.constant 0 : index
    %40 = vector.load %arg18[%c1_50, %c0_51] : memref<9x72xf32, #tpu.memory_space<vmem>>, vector<8x72xf32>
    %c0_52 = arith.constant 0 : index
    %c0_53 = arith.constant 0 : index
    %41 = vector.load %arg5[%c0_52, %c0_53] : memref<72x100xf32, #tpu.memory_space<vmem>>, vector<72x100xf32>
    %cst_54 = arith.constant dense<0.000000e+00> : vector<8x100xf32>
    %42 = tpu.matmul %40, %41, %cst_54 {dimension_numbers = #tpu.dot_dimension_numbers<[1], [0], [0], [1], [0, 0, 1, 1], [], []>} : vector<8x72xf32>, vector<72x100xf32>, vector<8x100xf32> -> vector<8x100xf32>
    %43 = arith.addf %39, %42 : vector<8x100xf32>
    %c0_55 = arith.constant 0 : index
    %c0_56 = arith.constant 0 : index
    %44 = vector.load %arg6[%c0_55, %c0_56] : memref<1x100xf32, #tpu.memory_space<vmem>>, vector<1x100xf32>
    %45 = vector.broadcast %44 : vector<1x100xf32> to vector<8x100xf32>
    %46 = arith.addf %43, %45 : vector<8x100xf32>
    %47 = arith.negf %46 : vector<8x100xf32>
    %48 = math.exp %47 : vector<8x100xf32>
    %cst_57 = arith.constant 1.000000e+00 : f32
    %49 = vector.broadcast %cst_57 : f32 to vector<8x100xf32>
    %50 = arith.addf %49, %48 : vector<8x100xf32>
    %51 = arith.divf %49, %50 : vector<8x100xf32>
    %52 = arith.mulf %46, %51 : vector<8x100xf32>
    %cst_58 = arith.constant 0.000000e+00 : f32
    %53 = vector.broadcast %cst_58 : f32 to vector<1x100xf32>
    %c0_59 = arith.constant 0 : index
    %c0_60 = arith.constant 0 : index
    %54 = vector.load %arg19[%c0_59, %c0_60] : memref<10x100xf32, #tpu.memory_space<vmem>>, vector<1x100xf32>
    tpu.vector_store %arg19[%c0_59, %c0_60], %53 {strides = array<i32>} : memref<10x100xf32, #tpu.memory_space<vmem>>, vector<1x100xf32>,
    %c9 = arith.constant 9 : index
    %c0_61 = arith.constant 0 : index
    %55 = vector.load %arg19[%c9, %c0_61] : memref<10x100xf32, #tpu.memory_space<vmem>>, vector<1x100xf32>
    tpu.vector_store %arg19[%c9, %c0_61], %53 {strides = array<i32>} : memref<10x100xf32, #tpu.memory_space<vmem>>, vector<1x100xf32>,
    %c1_62 = arith.constant 1 : index
    %c0_63 = arith.constant 0 : index
    %56 = vector.load %arg19[%c1_62, %c0_63] : memref<10x100xf32, #tpu.memory_space<vmem>>, vector<8x100xf32>
    tpu.vector_store %arg19[%c1_62, %c0_63], %52 {strides = array<i32>} : memref<10x100xf32, #tpu.memory_space<vmem>>, vector<8x100xf32>,
    %c0_64 = arith.constant 0 : index
    %c0_65 = arith.constant 0 : index
    %57 = vector.load %arg19[%c0_64, %c0_65] : memref<10x100xf32, #tpu.memory_space<vmem>>, vector<9x100xf32>
    %c0_66 = arith.constant 0 : index
    %c0_67 = arith.constant 0 : index
    %58 = vector.load %arg7[%c0_66, %c0_67] : memref<100x144xf32, #tpu.memory_space<vmem>>, vector<100x144xf32>
    %cst_68 = arith.constant dense<0.000000e+00> : vector<9x144xf32>
    %59 = tpu.matmul %57, %58, %cst_68 {dimension_numbers = #tpu.dot_dimension_numbers<[1], [0], [0], [1], [0, 0, 1, 1], [], []>} : vector<9x100xf32>, vector<100x144xf32>, vector<9x144xf32> -> vector<9x144xf32>
    %c1_69 = arith.constant 1 : index
    %c0_70 = arith.constant 0 : index
    %60 = vector.load %arg19[%c1_69, %c0_70] : memref<10x100xf32, #tpu.memory_space<vmem>>, vector<9x100xf32>
    %c0_71 = arith.constant 0 : index
    %c0_72 = arith.constant 0 : index
    %61 = vector.load %arg8[%c0_71, %c0_72] : memref<100x144xf32, #tpu.memory_space<vmem>>, vector<100x144xf32>
    %cst_73 = arith.constant dense<0.000000e+00> : vector<9x144xf32>
    %62 = tpu.matmul %60, %61, %cst_73 {dimension_numbers = #tpu.dot_dimension_numbers<[1], [0], [0], [1], [0, 0, 1, 1], [], []>} : vector<9x100xf32>, vector<100x144xf32>, vector<9x144xf32> -> vector<9x144xf32>
    %63 = arith.addf %59, %62 : vector<9x144xf32>
    %c0_74 = arith.constant 0 : index
    %c0_75 = arith.constant 0 : index
    %64 = vector.load %arg9[%c0_74, %c0_75] : memref<1x144xf32, #tpu.memory_space<vmem>>, vector<1x144xf32>
    %65 = vector.broadcast %64 : vector<1x144xf32> to vector<9x144xf32>
    %66 = arith.addf %63, %65 : vector<9x144xf32>
    %67 = arith.negf %66 : vector<9x144xf32>
    %68 = math.exp %67 : vector<9x144xf32>
    %cst_76 = arith.constant 1.000000e+00 : f32
    %69 = vector.broadcast %cst_76 : f32 to vector<9x144xf32>
    %70 = arith.addf %69, %68 : vector<9x144xf32>
    %71 = arith.divf %69, %70 : vector<9x144xf32>
    %72 = arith.mulf %66, %71 : vector<9x144xf32>
    %c0_77 = arith.constant 0 : index
    %c0_78 = arith.constant 0 : index
    %73 = vector.load %arg20[%c0_77, %c0_78] : memref<9x144xf32, #tpu.memory_space<vmem>>, vector<9x144xf32>
    tpu.vector_store %arg20[%c0_77, %c0_78], %72 {strides = array<i32>} : memref<9x144xf32, #tpu.memory_space<vmem>>, vector<9x144xf32>,
    %c0_79 = arith.constant 0 : index
    %c0_80 = arith.constant 0 : index
    %74 = vector.load %arg20[%c0_79, %c0_80] : memref<9x144xf32, #tpu.memory_space<vmem>>, vector<8x144xf32>
    %c0_81 = arith.constant 0 : index
    %c0_82 = arith.constant 0 : index
    %75 = vector.load %arg10[%c0_81, %c0_82] : memref<144x128xf32, #tpu.memory_space<vmem>>, vector<144x128xf32>
    %cst_83 = arith.constant dense<0.000000e+00> : vector<8x128xf32>
    %76 = tpu.matmul %74, %75, %cst_83 {dimension_numbers = #tpu.dot_dimension_numbers<[1], [0], [0], [1], [0, 0, 1, 1], [], []>} : vector<8x144xf32>, vector<144x128xf32>, vector<8x128xf32> -> vector<8x128xf32>
    %c1_84 = arith.constant 1 : index
    %c0_85 = arith.constant 0 : index
    %77 = vector.load %arg20[%c1_84, %c0_85] : memref<9x144xf32, #tpu.memory_space<vmem>>, vector<8x144xf32>
    %c0_86 = arith.constant 0 : index
    %c0_87 = arith.constant 0 : index
    %78 = vector.load %arg11[%c0_86, %c0_87] : memref<144x128xf32, #tpu.memory_space<vmem>>, vector<144x128xf32>
    %cst_88 = arith.constant dense<0.000000e+00> : vector<8x128xf32>
    %79 = tpu.matmul %77, %78, %cst_88 {dimension_numbers = #tpu.dot_dimension_numbers<[1], [0], [0], [1], [0, 0, 1, 1], [], []>} : vector<8x144xf32>, vector<144x128xf32>, vector<8x128xf32> -> vector<8x128xf32>
    %80 = arith.addf %76, %79 : vector<8x128xf32>
    %c0_89 = arith.constant 0 : index
    %c0_90 = arith.constant 0 : index
    %81 = vector.load %arg12[%c0_89, %c0_90] : memref<1x128xf32, #tpu.memory_space<vmem>>, vector<1x128xf32>
    %82 = vector.broadcast %81 : vector<1x128xf32> to vector<8x128xf32>
    %83 = arith.addf %80, %82 : vector<8x128xf32>
    %84 = arith.negf %83 : vector<8x128xf32>
    %85 = math.exp %84 : vector<8x128xf32>
    %cst_91 = arith.constant 1.000000e+00 : f32
    %86 = vector.broadcast %cst_91 : f32 to vector<8x128xf32>
    %87 = arith.addf %86, %85 : vector<8x128xf32>
    %88 = arith.divf %86, %87 : vector<8x128xf32>
    %89 = arith.mulf %83, %88 : vector<8x128xf32>
    %c0_92 = arith.constant 0 : index
    %c0_93 = arith.constant 0 : index
    %90 = vector.load %arg21[%c0_92, %c0_93] : memref<8x128xf32, #tpu.memory_space<vmem>>, vector<8x128xf32>
    tpu.vector_store %arg21[%c0_92, %c0_93], %89 {strides = array<i32>} : memref<8x128xf32, #tpu.memory_space<vmem>>, vector<8x128xf32>,
    %c0_94 = arith.constant 0 : index
    %c0_95 = arith.constant 0 : index
    %91 = vector.load %arg21[%c0_94, %c0_95] : memref<8x128xf32, #tpu.memory_space<vmem>>, vector<7x128xf32>
    %c0_96 = arith.constant 0 : index
    %c0_97 = arith.constant 0 : index
    %92 = vector.load %arg13[%c0_96, %c0_97] : memref<128x224xf32, #tpu.memory_space<vmem>>, vector<128x224xf32>
    %cst_98 = arith.constant dense<0.000000e+00> : vector<7x224xf32>
    %93 = tpu.matmul %91, %92, %cst_98 {dimension_numbers = #tpu.dot_dimension_numbers<[1], [0], [0], [1], [0, 0, 1, 1], [], []>} : vector<7x128xf32>, vector<128x224xf32>, vector<7x224xf32> -> vector<7x224xf32>
    %c1_99 = arith.constant 1 : index
    %c0_100 = arith.constant 0 : index
    %94 = vector.load %arg21[%c1_99, %c0_100] : memref<8x128xf32, #tpu.memory_space<vmem>>, vector<7x128xf32>
    %c0_101 = arith.constant 0 : index
    %c0_102 = arith.constant 0 : index
    %95 = vector.load %arg14[%c0_101, %c0_102] : memref<128x224xf32, #tpu.memory_space<vmem>>, vector<128x224xf32>
    %cst_103 = arith.constant dense<0.000000e+00> : vector<7x224xf32>
    %96 = tpu.matmul %94, %95, %cst_103 {dimension_numbers = #tpu.dot_dimension_numbers<[1], [0], [0], [1], [0, 0, 1, 1], [], []>} : vector<7x128xf32>, vector<128x224xf32>, vector<7x224xf32> -> vector<7x224xf32>
    %97 = arith.addf %93, %96 : vector<7x224xf32>
    %c0_104 = arith.constant 0 : index
    %c0_105 = arith.constant 0 : index
    %98 = vector.load %arg15[%c0_104, %c0_105] : memref<1x224xf32, #tpu.memory_space<vmem>>, vector<1x224xf32>
    %99 = vector.broadcast %98 : vector<1x224xf32> to vector<7x224xf32>
    %100 = arith.addf %97, %99 : vector<7x224xf32>
    %c0_106 = arith.constant 0 : index
    %c0_107 = arith.constant 0 : index
    %101 = vector.load %arg16[%c0_106, %c0_107] : memref<7x224xf32, #tpu.memory_space<vmem>>, vector<7x224xf32>
    tpu.vector_store %arg16[%c0_106, %c0_107], %100 {strides = array<i32>} : memref<7x224xf32, #tpu.memory_space<vmem>>, vector<7x224xf32>,
    return
  }
}

</mosaic_0001>

<bundles_post_ra>
// kernel: model_forward.1
= control target key start
LH: loop header
LB: loop body
LE: loop exit
PB: predicated region body
PF: predicated region fallthrough
CT: control target
= control target key end

     0   :  { %vm53_vm0 = vcmask 490496   ;;  %vm55_vm1 = vcmask 484352   ;;  %v1006_v2 = vmov 0.0   ;;  %s1007_s26 = smov 1   ;;  %s1008_s27 = smov 21   ;;  %vm330_vm2 = vcmask 811008   ;;  %s1728_s0 = inlined_call_operand.vmem [shape: f32[2,3,8,8], index: 0, kind: input, shape index: {}]   ;;  %s1729_s2 = inlined_call_operand.vmem [shape: f32[60,72], index: 2, kind: input, shape index: {}]   ;;  %s1730_s1 = inlined_call_operand.vmem [shape: f32[60,72], index: 1, kind: input, shape index: {}]   ;;  %s1731_s3 = inlined_call_operand.vmem [shape: f32[1,72], index: 3, kind: input, shape index: {}]   ;;  %s1732_s4 = inlined_call_operand.vmem [shape: f32[72,100], index: 4, kind: input, shape index: {}]   ;;  %s1733_s5 = inlined_call_operand.vmem [shape: f32[72,100], index: 5, kind: input, shape index: {}]   ;;  %s1734_s6 = inlined_call_operand.vmem [shape: f32[1,100], index: 6, kind: input, shape index: {}]   ;;  %s1735_s8 = inlined_call_operand.vmem [shape: f32[100,144], index: 8, kind: input, shape index: {}]   ;;  %s1736_s7 = inlined_call_operand.vmem [shape: f32[100,144], index: 7, kind: input, shape index: {}]   ;;  %s1737_s10 = inlined_call_operand.vmem [shape: f32[144,128], index: 10, kind: input, shape index: {}]   ;;  %s1738_s11 = inlined_call_operand.vmem [shape: f32[144,128], index: 11, kind: input, shape index: {}]   ;;  %s1739_s9 = inlined_call_operand.vmem [shape: f32[1,144], index: 9, kind: input, shape index: {}]   ;;  %s1740_s12 = inlined_call_operand.vmem [shape: f32[1,128], index: 12, kind: input, shape index: {}]   ;;  %s1741_s14 = inlined_call_operand.vmem [shape: f32[128,224], index: 14, kind: input, shape index: {}]   ;;  %s1742_s13 = inlined_call_operand.vmem [shape: f32[128,224], index: 13, kind: input, shape index: {}]   ;;  %s1743_s15 = inlined_call_operand.vmem [shape: f32[1,224], index: 15, kind: input, shape index: {}]   ;;  %s1744_s16 = inlined_call_operand.vmem [shape: f32[7,224], index: 16, kind: output, shape index: {}]  }
   0x1   :  { %1746 = sst [smem:[#allocation7_spill]] %s1728_s0  ;;  %54 = vst.msk [vmem:[#allocation2] sm:$0xff] %vm53_vm0, %v1006_v2  ;;  %s1009_s30 = smov 41   ;;  %v123_v7 = vld [vmem:[%s1729_s2 + $0x38] sm:$0xf]  ;;  %vm130_vm3 = vcmask 1043456  }
   0x2   :  { %s1747_s23 = sld [smem:[#allocation7_spill]]  ;;  %56 = vst.msk [vmem:[#allocation2 + $0x8] sm:$0x3] %vm55_vm1, %v1006_v2  ;;  %s1010_s22 = smov 11   ;;  %v113_v8 = vld [vmem:[%s1730_s1 + $0x38] sm:$0xf]  ;;  %934 = vmatpush.msk.msra.mxu0 %vm130_vm3, %v123_v7 }
   0x3   :  { %331 = vst.msk [vmem:[#allocation4] sm:$0x1] %vm330_vm2, %v1006_v2  ;;  %s1011_s24 = smov 31   ;;  %s1012_s25 = smov 51   ;;  %v122_v9 = vld [vmem:[%s1729_s2 + $0x30] sm:$0xff]  ;;  %937 = vmatpush.msk.msra.mxu1 %vm130_vm3, %v113_v8  ;;  %v121_v11 = vld [vmem:[%s1729_s2 + $0x28] sm:$0xff] }
   0x4   :  { %332 = vst.msk [vmem:[#allocation4 + $0x9] sm:$0x1] %vm330_vm2, %v1006_v2  ;;  %v112_v10 = vld [vmem:[%s1730_s1 + $0x30] sm:$0xff]  ;;  %143 = vmatpush.msra.mxu0 %v122_v9  ;;  %v111_v12 = vld [vmem:[%s1730_s1 + $0x28] sm:$0xff]  ;;  %v120_v13 = vld [vmem:[%s1729_s2 + $0x20] sm:$0xff]  ;;  %vm62_vm4 = vcmask 72712  }
   0x5   :  { %175 = vmatpush.msra.mxu1 %v112_v10  ;;  %v110_v14 = vld [vmem:[%s1730_s1 + $0x20] sm:$0xff]  ;;  %v119_v15 = vld [vmem:[%s1729_s2 + $0x18] sm:$0xff]  ;;  %v118_v17 = vld [vmem:[%s1729_s2 + $0x10] sm:$0xff]  ;;  %vm70_vm5 = vcmask 154712   ;;  %vm78_vm6 = vcmask 236712   ;;  %vm86_vm7 = vcmask 318712  }
   0x6   :  { %144 = vmatpush.msra.mxu0 %v121_v11  ;;  %v109_v16 = vld [vmem:[%s1730_s1 + $0x18] sm:$0xff]  ;;  %v108_v18 = vld [vmem:[%s1730_s1 + $0x10] sm:$0xff]  ;;  %v117_v19 = vld [vmem:[%s1729_s2 + $0x8] sm:$0xff]  ;;  %vm94_vm8 = vcmask 400712   ;;  %vm102_vm9 = vcmask 482712   ;;  %vm235_vm14 = vcmask 588800  }
   0x7   :  { %176 = vmatpush.msra.mxu1 %v111_v12  ;;  %v107_v20 = vld [vmem:[%s1730_s1 + $0x8] sm:$0xff]  ;;  %v116_v21 = vld [vmem:[%s1729_s2] sm:$0xff]  ;;  %v247_v34 = vld [vmem:[%s1732_s4 + $0x38] sm:$0xff] }
   0x8   :  { %v57_v0 = vld [vmem:[%s1747_s23] sm:$0xff]  ;;  %v930_v1 = vld [vmem:[%s1747_s23 + $0x10] sm:$0xff]  ;;  %v929_v4 = vld [vmem:[%s1747_s23 + $0x8] sm:$0xff]  ;;  %145 = vmatpush.msra.mxu0 %v120_v13 }
   0x9   :  { %59 = vrot.lane.b32.xlu0 %v57_v0, %s1007_s26  ;;  %75 = vrot.lane.b32.xlu1 %v930_v1, %s1008_s27  ;;  %v932_v3 = vld [vmem:[%s1747_s23 + $0x20] sm:$0xff]  ;;  %v931_v5 = vld [vmem:[%s1747_s23 + $0x18] sm:$0xff]  ;;  %v115_v31 = vld [vmem:[#allocation2 + $0x9] sm:$0x1] }
   0xa   :  { %91 = vrot.lane.b32.xlu2 %v932_v3, %s1009_s30  ;;  %v933_v6 = vld [vmem:[%s1747_s23 + $0x28] sm:$0xff]  ;;  %177 = vmatpush.msra.mxu1 %v110_v14  ;;  %v106_v22 = vld [vmem:[%s1730_s1] sm:$0xff]  ;;  %v246_v35 = vld [vmem:[%s1732_s4 + $0x30] sm:$0xff] }
   0xb   :  { %146 = vmatpush.msra.mxu0 %v119_v15  ;;  %v248_v33 = vld [vmem:[%s1732_s4 + $0x40] sm:$0xff]  ;;  %v245_v37 = vld [vmem:[%s1732_s4 + $0x28] sm:$0xff]  ;;  %v257_v44 = vld [vmem:[%s1733_s5 + $0x38] sm:$0xff] }
   0xc   :  { %178 = vmatpush.msra.mxu1 %v109_v16  ;;  %292 = vmatpush.msra.mxu3 %v248_v33  ;;  %v971_v36 = vld [vmem:[%s1731_s3] ss:$0 sm:$0xff]  ;;  %v243_v45 = vld [vmem:[%s1732_s4 + $0x18] sm:$0xff]  ;;  %v256_v47 = vld [vmem:[%s1733_s5 + $0x30] sm:$0xff] }
   0xd   :  { %147 = vmatpush.msra.mxu0 %v118_v17  ;;  %v258_v41 = vld [vmem:[%s1733_s5 + $0x40] sm:$0xff]  ;;  %v242_v48 = vld [vmem:[%s1732_s4 + $0x10] sm:$0xff]  ;;  %v255_v49 = vld [vmem:[%s1733_s5 + $0x28] sm:$0xff] }
   0xe   :  { %179 = vmatpush.msra.mxu1 %v108_v18  ;;  %293 = vmatpush.msra.mxu3 %v247_v34  ;;  %v244_v42 = vld [vmem:[%s1732_s4 + $0x20] sm:$0xff]  ;;  %v241_v50 = vld [vmem:[%s1732_s4 + $0x8] sm:$0xff]  ;;  %v253_v57 = vld [vmem:[%s1733_s5 + $0x18] sm:$0xff] }
   0xf   :  { %148 = vmatpush.msra.mxu0 %v117_v19  ;;  %269 = vmatpush.msra.mxu2 %v258_v41  ;;  %v254_v54 = vld [vmem:[%s1733_s5 + $0x20] sm:$0xff]  ;;  %v252_v58 = vld [vmem:[%s1733_s5 + $0x10] sm:$0xff]  ;;  %v251_v61 = vld [vmem:[%s1733_s5 + $0x8] sm:$0xff] }
  0x10   :  { %180 = vmatpush.msra.mxu1 %v107_v20  ;;  %294 = vmatpush.msra.mxu3 %v246_v35  ;;  %v240_v55 = vld [vmem:[%s1732_s4] sm:$0xff]  ;;  %v360_v33 = vld [vmem:[%s1736_s7 + $0xb8] sm:$0xff]  ;;  %v386_v35 = vld [vmem:[%s1735_s8 + $0xa8] sm:$0xff] }
  0x11   :  { %67 = vrot.lane.b32.xlu0 %v929_v4, %s1010_s22  ;;  %83 = vrot.lane.b32.xlu1 %v931_v5, %s1011_s24  ;;  %v250_v63 = vld [vmem:[%s1733_s5] sm:$0xff]  ;;  %v356_v41 = vld [vmem:[%s1736_s7 + $0x98] sm:$0xff] }
  0x12   :  { %99 = vrot.lane.b32.xlu2 %v933_v6, %s1012_s25  ;;  %149 = vmatpush.msra.mxu0 %v116_v21  ;;  %v385_v34 = vld [vmem:[%s1735_s8 + $0xa0] sm:$0xff] }
  0x13   :  { %181 = vmatpush.msra.mxu1 %v106_v22  ;;  %295 = vmatpush.msra.mxu3 %v245_v37  ;;  %v358_v37 = vld [vmem:[%s1736_s7 + $0xa8] sm:$0xff] }
  0x14   :  { %270 = vmatpush.msra.mxu2 %v257_v44  ;;  %v353_v44 = vld [vmem:[%s1736_s7 + $0x80] sm:$0xff] }
  0x15   :  { %296 = vmatpush.msra.mxu3 %v244_v42  ;;  %v381_v42 = vld [vmem:[%s1735_s8 + $0x80] sm:$0xff] }
  0x16   :  { %271 = vmatpush.msra.mxu2 %v256_v47  ;;  %v380_v47 = vld [vmem:[%s1735_s8 + $0x78] sm:$0xff] }
  0x17   :  { %297 = vmatpush.msra.mxu3 %v243_v45  ;;  %v354_v45 = vld [vmem:[%s1736_s7 + $0x88] sm:$0xff] }
  0x18   :  { %272 = vmatpush.msra.mxu2 %v255_v49  ;;  %v352_v49 = vld [vmem:[%s1736_s7 + $0x78] sm:$0xff] }
  0x19   :  { %298 = vmatpush.msra.mxu3 %v242_v48  ;;  %v351_v48 = vld [vmem:[%s1736_s7 + $0x70] sm:$0xff] }
  0x1a   :  { %273 = vmatpush.msra.mxu2 %v254_v54  ;;  %v350_v54 = vld [vmem:[%s1736_s7 + $0x68] sm:$0xff] }
  0x1b   :  { %299 = vmatpush.msra.mxu3 %v241_v50  ;;  %v377_v50 = vld [vmem:[%s1735_s8 + $0x60] sm:$0xff] }
  0x1c   :  { %274 = vmatpush.msra.mxu2 %v253_v57  ;;  %v347_v57 = vld [vmem:[%s1736_s7 + $0x50] sm:$0xff] }
  0x1d   :  { %300 = vmatpush.msra.mxu3 %v240_v55  ;;  %v375_v55 = vld [vmem:[%s1735_s8 + $0x50] sm:$0xff] }
  0x1e   :  { %275 = vmatpush.msra.mxu2 %v252_v58 }
  0x20   :  { %276 = vmatpush.msra.mxu2 %v251_v61 }
  0x22   :  { %277 = vmatpush.msra.mxu2 %v250_v63  ;;  %v374_v63 = vld [vmem:[%s1735_s8 + $0x48] sm:$0xff] }
  0x64   :  { %v92_v23 = vpop.permute.xlu2 %91 }
  0x6c   :  { %v100_v28 = vpop.permute.xlu2 %99 }
  0x7b   :  { %v60_v24 = vpop.permute.xlu0 %59  ;;  %v76_v25 = vpop.permute.xlu1 %75 }
  0x7c   :  { %63 = vst.msk [vmem:[#allocation2 + $0x1] sm:$0xff] %vm62_vm4, %v60_v24  ;;  %vm237_vm4 = vcmask 581632  }
  0x83   :  { %v68_v26 = vpop.permute.xlu0 %67  ;;  %v84_v27 = vpop.permute.xlu1 %83 }
  0x84   :  { %71 = vst.msk [vmem:[#allocation2 + $0x1] sm:$0xff] %vm70_vm5, %v68_v26  ;;  %v389_v26 = vld [vmem:[%s1735_s8 + $0xc0] sm:$0xf] }
  0x85   :  { %79 = vst.msk [vmem:[#allocation2 + $0x1] sm:$0xff] %vm78_vm6, %v76_v25  ;;  %945 = vmatpush.msk.msrb.mxu0 %vm130_vm3, %v389_v26 }
  0x86   :  { %87 = vst.msk [vmem:[#allocation2 + $0x1] sm:$0xff] %vm86_vm7, %v84_v27  ;;  %v390_v27 = vld [vmem:[%s1735_s8 + $0xc8] sm:$0xf] }
  0x87   :  { %95 = vst.msk [vmem:[#allocation2 + $0x1] sm:$0xff] %vm94_vm8, %v92_v23  ;;  %948 = vmatpush.msk.msrb.mxu1 %vm130_vm3, %v390_v27  ;;  %vm333_vm8 = vcmask 818176  }
  0x88   :  { %103 = vst.msk [vmem:[#allocation2 + $0x1] sm:$0xff] %vm102_vm9, %v100_v28  ;;  %v361_v28 = vld [vmem:[%s1736_s7 + $0xc0] sm:$0xf] }
  0x89   :  { %951 = vmatpush.msk.msrb.mxu2 %vm130_vm3, %v361_v28 }
  0x8f   :  { %v114_v29 = vld [vmem:[#allocation2 + $0x1] sm:$0xff] }
  0x90   :  { %v104_v30 = vld [vmem:[#allocation2] sm:$0xff]  ;;  %935 = vmatmul.msk.f32.vlgmr.msra.gmra.mxu0 %vm53_vm0, %v114_v29  ;;  %v105_v32 = vld [vmem:[#allocation2 + $0x8] sm:$0x1] }
  0x91   :  { %938 = vmatmul.msk.f32.vlgmr.msra.gmra.mxu1 %vm53_vm0, %v104_v30  ;;  %v362_v29 = vld [vmem:[%s1736_s7 + $0xc8] sm:$0xf]  ;;  %v387_v30 = vld [vmem:[%s1735_s8 + $0xb0] sm:$0xff] }
  0x92   :  { %954 = vmatpush.msk.msrb.mxu3 %vm130_vm3, %v362_v29  ;;  %407 = vmatpush.msrb.mxu0 %v387_v30 }
  0x94   :  { %488 = vmatpush.msrb.mxu3 %v360_v33  ;;  %408 = vmatpush.msrb.mxu0 %v385_v34 }
  0x96   :  { %489 = vmatpush.msrb.mxu3 %v358_v37  ;;  %v620_v37 = vld [vmem:[%s1737_s10 + $0x78] sm:$0xff] }
  0x98   :  { %936 = vmatmul.msk.f32.gmra.mxu0 %vm53_vm0, %v115_v31  ;;  %v388_v31 = vld [vmem:[%s1735_s8 + $0xb8] sm:$0xff]  ;;  %490 = vmatpush.msrb.mxu3 %v356_v41 }
  0x99   :  { %939 = vmatmul.msk.f32.gmra.mxu1 %vm53_vm0, %v105_v32  ;;  %v359_v32 = vld [vmem:[%s1736_s7 + $0xb0] sm:$0xff]  ;;  %v616_v41 = vld [vmem:[%s1737_s10 + $0x58] sm:$0xff] }
  0x9a   :  { %430 = vmatpush.msrb.mxu1 %v388_v31  ;;  %465 = vmatpush.msrb.mxu2 %v359_v32 }
  0x9b   :  { %491 = vmatpush.msrb.mxu3 %v354_v45  ;;  %v612_v45 = vld [vmem:[%s1737_s10 + $0x38] sm:$0xff] }
  0x9c   :  { %431 = vmatpush.msrb.mxu1 %v386_v35  ;;  %v364_v35 = vld [vmem:[#allocation4 + $0x9] sm:$0x1] }
  0x9d   :  { %492 = vmatpush.msrb.mxu3 %v352_v49  ;;  %v507_v49 = vld [vmem:[%s1739_s9] sm:$0x3] }
  0x9f   :  { %493 = vmatpush.msrb.mxu3 %v350_v54  ;;  %v640_v54 = vld [vmem:[%s1738_s11 + $0x68] sm:$0xff] }
 0x10d   :  { %v151_v38 = vpop.f32.mrf.mxu0 }
 0x10e   :  { %v183_v39 = vpop.f32.mrf.mxu1 }
 0x10f   :  { %v184_v40 = vadd.f32 %v183_v39, %v151_v38  ;;  %v383_v38 = vld [vmem:[%s1735_s8 + $0x90] sm:$0xff]  ;;  %v384_v39 = vld [vmem:[%s1735_s8 + $0x98] sm:$0xff] }
 0x110   :  { %409 = vmatpush.msrb.mxu0 %v383_v38  ;;  %432 = vmatpush.msrb.mxu1 %v384_v39  ;;  %v619_v38 = vld [vmem:[%s1737_s10 + $0x70] sm:$0xff]  ;;  %v618_v39 = vld [vmem:[%s1737_s10 + $0x68] sm:$0xff] }
 0x111   :  { %v193_v43 = vadd.f32 %v971_v36, %v184_v40  ;;  %v355_v40 = vld [vmem:[%s1736_s7 + $0x90] sm:$0xff] }
 0x112   :  { %410 = vmatpush.msrb.mxu0 %v381_v42  ;;  %v615_v42 = vld [vmem:[%s1737_s10 + $0x50] sm:$0xff] }
 0x113   :  { %v940_v46 = vmul.f32 -1.442695, %v193_v43 }
 0x115   :  { %974 = vpow2.f32 %v940_v46  ;;  %v154_v51 = vpop.f32.mrf.mxu0  ;;  %v379_v46 = vld [vmem:[%s1735_s8 + $0x70] sm:$0xff] }
 0x116   :  { %v186_v52 = vpop.f32.mrf.mxu1  ;;  %411 = vmatpush.msrb.mxu0 %v379_v46  ;;  %v611_v46 = vld [vmem:[%s1737_s10 + $0x30] sm:$0xff] }
 0x117   :  { %v187_v53 = vadd.f32 %v186_v52, %v154_v51  ;;  %v378_v51 = vld [vmem:[%s1735_s8 + $0x68] sm:$0xff]  ;;  %v349_v52 = vld [vmem:[%s1736_s7 + $0x60] sm:$0xff] }
 0x118   :  { %412 = vmatpush.msrb.mxu0 %v377_v50  ;;  %v641_v50 = vld [vmem:[%s1738_s11 + $0x70] sm:$0xff] }
 0x119   :  { %v194_v56 = vadd.f32 %v971_v36, %v187_v53  ;;  %v357_v36 = vld [vmem:[%s1736_s7 + $0xa0] sm:$0xff] }
 0x11a   :  { %466 = vmatpush.msrb.mxu2 %v357_v36  ;;  %v972_v53 = vld [vmem:[%s1734_s6] ss:$0 sm:$0xff]  ;;  %413 = vmatpush.msrb.mxu0 %v375_v55  ;;  %v509_v55 = vperm.slane %v507_v49, 0 }
 0x11b   :  { %v975_v59 = vpop.eup %974  ;;  %v941_v60 = vmul.f32 -1.442695, %v194_v56 }
 0x11c   :  { %v201_v62 = vadd.f32 1.0, %v975_v59  ;;  %467 = vmatpush.msrb.mxu2 %v355_v40  ;;  %v617_v40 = vld [vmem:[%s1737_s10 + $0x60] sm:$0xff] }
 0x11d   :  { %976 = vpow2.f32 %v941_v60  ;;  %v348_v60 = vld [vmem:[%s1736_s7 + $0x58] sm:$0xff] }
 0x11e   :  { %978 = vrcp.f32 %v201_v62  ;;  %v214_v5 = vand.u32 2147483648, %v201_v62  ;;  %v212_v7 = vand.u32 2147483647, %v201_v62  ;;  %vm208_vm11 = vweird.f32 %v201_v62  ;;  %468 = vmatpush.msrb.mxu2 %v353_v44  ;;  %494 = vmatpush.msrb.mxu3 %v348_v60  ;;  %v613_v44 = vld [vmem:[%s1737_s10 + $0x40] sm:$0xff] }
 0x11f   :  { %v639_v60 = vld [vmem:[%s1738_s11 + $0x60] sm:$0xff] }
 0x120   :  { %v215_v10 = vor.u32 1.1754944e-38, %v214_v5  ;;  %vm213_vm13 = vcmp.eq.f32.partialorder %v212_v7, 8.507059e+37  ;;  %469 = vmatpush.msrb.mxu2 %v351_v48  ;;  %v343_v5 = vld [vmem:[%s1736_s7 + $0x30] sm:$0xff]  ;;  %v369_v7 = vld [vmem:[%s1735_s8 + $0x20] sm:$0xff]  ;;  %v610_v48 = vld [vmem:[%s1737_s10 + $0x28] sm:$0xff] }
 0x122   :  { %470 = vmatpush.msrb.mxu2 %v349_v52 }
 0x123   :  { %v977_v0 = vpop.eup %976 }
 0x124   :  { %v979_v1 = vpop.eup %978  ;;  %v202_v2 = vadd.f32 1.0, %v977_v0  ;;  %471 = vmatpush.msrb.mxu2 %v347_v57  ;;  %v345_v0 = vld [vmem:[%s1736_s7 + $0x40] sm:$0xff]  ;;  %v608_v57 = vld [vmem:[%s1737_s10 + $0x18] sm:$0xff] }
 0x125   :  { %v204_v3 = vmul.f32 %v979_v1, %v201_v62  ;;  %vm209_vm10 = vweird.f32 %v979_v1  ;;  %v373_v62 = vld [vmem:[%s1735_s8 + $0x40] sm:$0xff] }
 0x126   :  { %980 = vrcp.f32 %v202_v2  ;;  %vm210_vm12 = vmor %vm208_vm11, %vm209_vm10  ;;  %v229_v16 = vand.u32 2147483648, %v202_v2  ;;  %v227_v18 = vand.u32 2147483647, %v202_v2  ;;  %vm223_vm0 = vweird.f32 %v202_v2  ;;  %414 = vmatpush.msrb.mxu0 %v373_v62  ;;  %472 = vmatpush.msrb.mxu2 %v345_v0  ;;  %v638_v0 = vld [vmem:[%s1738_s11 + $0x58] sm:$0xff] }
 0x127   :  { %v205_v4 = vsub.f32 1.0, %v204_v3  ;;  %v371_v3 = vld [vmem:[%s1735_s8 + $0x30] sm:$0xff] }
 0x128   :  { %v230_v20 = vor.u32 1.1754944e-38, %v229_v16  ;;  %vm228_vm2 = vcmp.eq.f32.partialorder %v227_v18, 8.507059e+37  ;;  %415 = vmatpush.msrb.mxu0 %v371_v3  ;;  %473 = vmatpush.msrb.mxu2 %v343_v5  ;;  %v365_v16 = vld [vmem:[%s1735_s8] sm:$0xff]  ;;  %v606_v3 = vld [vmem:[%s1737_s10 + $0x8] sm:$0xff] }
 0x129   :  { %v206_v6 = vmul.f32 %v979_v1, %v205_v4  ;;  %v372_v4 = vld [vmem:[%s1735_s8 + $0x38] sm:$0xff]  ;;  %v337_v18 = vld [vmem:[%s1736_s7] sm:$0xff] }
 0x12a   :  { %416 = vmatpush.msrb.mxu0 %v369_v7  ;;  %v605_v7 = vld [vmem:[%s1737_s10] sm:$0xff] }
 0x12b   :  { %v207_v8 = vadd.f32 %v979_v1, %v206_v6  ;;  %v344_v6 = vld [vmem:[%s1736_s7 + $0x38] sm:$0xff] }
 0x12c   :  { %v981_v9 = vpop.eup %980 }
 0x12d   :  { %v211_v11 = vsel %vm210_vm12, %v979_v1, %v207_v8  ;;  %v219_v12 = vmul.f32 %v981_v9, %v202_v2  ;;  %vm224_vm15 = vweird.f32 %v981_v9  ;;  %v346_v1 = vld [vmem:[%s1736_s7 + $0x48] sm:$0xff] }
 0x12e   :  { %v216_v13 = vsel %vm213_vm13, %v215_v10, %v211_v11  ;;  %vm225_vm1 = vmor %vm223_vm0, %vm224_vm15  ;;  %495 = vmatpush.msrb.mxu3 %v346_v1  ;;  %v370_v8 = vld [vmem:[%s1735_s8 + $0x28] sm:$0xff]  ;;  %v341_v10 = vld [vmem:[%s1736_s7 + $0x20] sm:$0xff] }
 0x12f   :  { %v233_v14 = vmul.f32 %v216_v13, %v193_v43  ;;  %v220_v15 = vsub.f32 1.0, %v219_v12  ;;  %v382_v43 = vld [vmem:[%s1735_s8 + $0x88] sm:$0xff]  ;;  %v367_v12 = vld [vmem:[%s1735_s8 + $0x10] sm:$0xff]  ;;  %v368_v13 = vld [vmem:[%s1735_s8 + $0x18] sm:$0xff]  ;;  %474 = vmatpush.msrb.mxu2 %v341_v10 }
 0x130   :  { %433 = vmatpush.msrb.mxu1 %v382_v43  ;;  %496 = vmatpush.msrb.mxu3 %v344_v6  ;;  %v342_v11 = vld [vmem:[%s1736_s7 + $0x28] sm:$0xff] }
 0x131   :  { %v221_v17 = vmul.f32 %v981_v9, %v220_v15  ;;  %236 = vst.msk [vmem:[#allocation3] sm:$0xff] %vm235_vm14, %v233_v14  ;;  %v339_v14 = vld [vmem:[%s1736_s7 + $0x10] sm:$0xff]  ;;  %v340_v15 = vld [vmem:[%s1736_s7 + $0x18] sm:$0xff]  ;;  %417 = vmatpush.msrb.mxu0 %v367_v12  ;;  %v614_v43 = vld [vmem:[%s1737_s10 + $0x48] sm:$0xff] }
 0x132   :  { %434 = vmatpush.msrb.mxu1 %v380_v47  ;;  %497 = vmatpush.msrb.mxu3 %v342_v11  ;;  %v642_v47 = vld [vmem:[%s1738_s11 + $0x78] sm:$0xff]  ;;  %v636_v10 = vld [vmem:[%s1738_s11 + $0x48] sm:$0xff] }
 0x133   :  { %v222_v19 = vadd.f32 %v981_v9, %v221_v17  ;;  %v366_v17 = vld [vmem:[%s1735_s8 + $0x8] sm:$0xff]  ;;  %475 = vmatpush.msrb.mxu2 %v339_v14  ;;  %418 = vmatpush.msrb.mxu0 %v365_v16  ;;  %v634_v16 = vld [vmem:[%s1738_s11 + $0x38] sm:$0xff] }
 0x134   :  { %435 = vmatpush.msrb.mxu1 %v378_v51  ;;  %498 = vmatpush.msrb.mxu3 %v340_v15  ;;  %v609_v51 = vld [vmem:[%s1737_s10 + $0x20] sm:$0xff] }
 0x135   :  { %v226_v21 = vsel %vm225_vm1, %v981_v9, %v222_v19  ;;  %v338_v19 = vld [vmem:[%s1736_s7 + $0x8] sm:$0xff]  ;;  %476 = vmatpush.msrb.mxu2 %v337_v18  ;;  %659 = vmatpush.msra.mxu0 %v642_v47  ;;  %vm598_vm1 = vcmask 130048  }
 0x136   :  { %v231_v22 = vsel %vm228_vm2, %v230_v20, %v226_v21  ;;  %499 = vmatpush.msrb.mxu3 %v338_v19  ;;  %v622_v19 = vld [vmem:[%s1737_s10 + $0x88] sm:$0xff] }
 0x137   :  { %v234_v23 = vmul.f32 %v231_v22, %v194_v56  ;;  %v376_v56 = vld [vmem:[%s1735_s8 + $0x58] sm:$0xff]  ;;  %660 = vmatpush.msra.mxu0 %v641_v50 }
 0x138   :  { %v239_v24 = vld [vmem:[#allocation3] sm:$0xff]  ;;  %436 = vmatpush.msrb.mxu1 %v376_v56  ;;  %v510_v56 = vperm.slane %v507_v49, 1 }
 0x139   :  { %238 = vst.msk [vmem:[#allocation3 + $0x8] sm:$0x1] %vm237_vm4, %v234_v23  ;;  %943 = vmatmul.msk.f32.vlgmr.msra.gmra.mxu3 %vm235_vm14, %v239_v24  ;;  %661 = vmatpush.msra.mxu0 %v640_v54 }
 0x13a   :  { %437 = vmatpush.msrb.mxu1 %v374_v63  ;;  %v607_v63 = vld [vmem:[%s1737_s10 + $0x10] sm:$0xff]  ;;  %736 = vmatpush.msra.mxu3 %v622_v19 }
 0x13b   :  { %662 = vmatpush.msra.mxu0 %v639_v60 }
 0x13c   :  { %438 = vmatpush.msrb.mxu1 %v372_v4  ;;  %v637_v4 = vld [vmem:[%s1738_s11 + $0x50] sm:$0xff] }
 0x13d   :  { %663 = vmatpush.msra.mxu0 %v638_v0 }
 0x13e   :  { %439 = vmatpush.msrb.mxu1 %v370_v8 }
 0x13f   :  { %664 = vmatpush.msra.mxu0 %v637_v4 }
 0x140   :  { %v249_v25 = vld [vmem:[#allocation3 + $0x1] sm:$0xff]  ;;  %440 = vmatpush.msrb.mxu1 %v368_v13  ;;  %v635_v13 = vld [vmem:[%s1738_s11 + $0x40] sm:$0xff] }
 0x141   :  { %942 = vmatmul.msk.f32.vlgmr.msra.gmra.mxu2 %vm235_vm14, %v249_v25  ;;  %665 = vmatpush.msra.mxu0 %v636_v10 }
 0x142   :  { %441 = vmatpush.msrb.mxu1 %v366_v17  ;;  %702 = vmatpush.msra.mxu2 %v620_v37 }
 0x143   :  { %666 = vmatpush.msra.mxu0 %v635_v13 }
 0x144   :  { %703 = vmatpush.msra.mxu2 %v619_v38  ;;  %v627_v38 = vld [vmem:[%s1738_s11] sm:$0xff] }
 0x145   :  { %667 = vmatpush.msra.mxu0 %v634_v16 }
 0x146   :  { %704 = vmatpush.msra.mxu2 %v618_v39 }
 0x148   :  { %705 = vmatpush.msra.mxu2 %v617_v40 }
 0x14a   :  { %706 = vmatpush.msra.mxu2 %v616_v41 }
 0x14c   :  { %707 = vmatpush.msra.mxu2 %v615_v42 }
 0x14e   :  { %708 = vmatpush.msra.mxu2 %v614_v43 }
 0x150   :  { %709 = vmatpush.msra.mxu2 %v613_v44 }
 0x152   :  { %710 = vmatpush.msra.mxu2 %v612_v45 }
 0x154   :  { %711 = vmatpush.msra.mxu2 %v611_v46 }
 0x156   :  { %712 = vmatpush.msra.mxu2 %v610_v48 }
 0x158   :  { %713 = vmatpush.msra.mxu2 %v609_v51 }
 0x15a   :  { %714 = vmatpush.msra.mxu2 %v608_v57 }
 0x15c   :  { %715 = vmatpush.msra.mxu2 %v607_v63 }
 0x15e   :  { %716 = vmatpush.msra.mxu2 %v606_v3 }
 0x160   :  { %717 = vmatpush.msra.mxu2 %v605_v7 }
 0x1bc   :  { %v302_v58 = vpop.f32.mrf.mxu3 }
 0x1c4   :  { %v279_v59 = vpop.f32.mrf.mxu2 }
 0x1c5   :  { %v303_v61 = vadd.f32 %v302_v58, %v279_v59 }
 0x1c7   :  { %v309_v2 = vadd.f32 %v972_v53, %v303_v61 }
 0x1c9   :  { %v944_v9 = vmul.f32 -1.442695, %v309_v2 }
 0x1cb   :  { %982 = vpow2.f32 %v944_v9 }
 0x1d1   :  { %v983_v20 = vpop.eup %982 }
 0x1d2   :  { %v313_v21 = vadd.f32 1.0, %v983_v20  ;;  %v633_v20 = vld [vmem:[%s1738_s11 + $0x30] sm:$0xff] }
 0x1d3   :  { %668 = vmatpush.msra.mxu0 %v633_v20 }
 0x1d4   :  { %984 = vrcp.f32 %v313_v21  ;;  %v325_v25 = vand.u32 2147483648, %v313_v21  ;;  %v323_v27 = vand.u32 2147483647, %v313_v21  ;;  %vm319_vm5 = vweird.f32 %v313_v21 }
 0x1d6   :  { %v326_v29 = vor.u32 1.1754944e-38, %v325_v25  ;;  %vm324_vm7 = vcmp.eq.f32.partialorder %v323_v27, 8.507059e+37  ;;  %v644_v27 = vld [vmem:[%s1738_s11 + $0x88] sm:$0xff] }
 0x1d7   :  { %693 = vmatpush.msra.mxu1 %v644_v27 }
 0x1da   :  { %v985_v22 = vpop.eup %984 }
 0x1db   :  { %v315_v23 = vmul.f32 %v985_v22, %v313_v21  ;;  %vm320_vm3 = vweird.f32 %v985_v22 }
 0x1dc   :  { %vm321_vm6 = vmor %vm319_vm5, %vm320_vm3 }
 0x1dd   :  { %v316_v24 = vsub.f32 1.0, %v315_v23  ;;  %v621_v23 = vld [vmem:[%s1737_s10 + $0x80] sm:$0xff] }
 0x1de   :  { %737 = vmatpush.msra.mxu3 %v621_v23 }
 0x1df   :  { %v317_v26 = vmul.f32 %v985_v22, %v316_v24 }
 0x1e1   :  { %v318_v28 = vadd.f32 %v985_v22, %v317_v26 }
 0x1e3   :  { %v322_v30 = vsel %vm321_vm6, %v985_v22, %v318_v28  ;;  %v632_v28 = vld [vmem:[%s1738_s11 + $0x28] sm:$0xff] }
 0x1e4   :  { %v327_v31 = vsel %vm324_vm7, %v326_v29, %v322_v30  ;;  %v631_v29 = vld [vmem:[%s1738_s11 + $0x20] sm:$0xff]  ;;  %669 = vmatpush.msra.mxu0 %v632_v28 }
 0x1e5   :  { %v329_v32 = vmul.f32 %v327_v31, %v309_v2  ;;  %v643_v31 = vld [vmem:[%s1738_s11 + $0x80] sm:$0xff] }
 0x1e6   :  { %670 = vmatpush.msra.mxu0 %v631_v29  ;;  %694 = vmatpush.msra.mxu1 %v643_v31 }
 0x1e7   :  { %334 = vst.msk [vmem:[#allocation4 + $0x1] sm:$0xff] %vm333_vm8, %v329_v32  ;;  %v630_v32 = vld [vmem:[%s1738_s11 + $0x18] sm:$0xff] }
 0x1e8   :  { %671 = vmatpush.msra.mxu0 %v630_v32  ;;  %v833_v32 = vld [vmem:[%s1741_s14 + $0xf8] sm:$0xff] }
 0x1ee   :  { %v363_v33 = vld [vmem:[#allocation4 + $0x1] sm:$0xff] }
 0x1ef   :  { %v335_v34 = vld [vmem:[#allocation4] sm:$0xff]  ;;  %946 = vmatmul.msk.f32.vlgmr.msrb.gmra.mxu0 %vm333_vm8, %v363_v33  ;;  %949 = vmatmul.msk.f32.vlgmr.msrb.gmra.mxu1 %vm333_vm8, %v363_v33  ;;  %v336_v36 = vld [vmem:[#allocation4 + $0x8] sm:$0x1]  ;;  %v629_v33 = vld [vmem:[%s1738_s11 + $0x10] sm:$0xff] }
 0x1f0   :  { %952 = vmatmul.msk.f32.vlgmr.msrb.gmra.mxu2 %vm333_vm8, %v335_v34  ;;  %955 = vmatmul.msk.f32.vlgmr.msrb.gmra.mxu3 %vm333_vm8, %v335_v34  ;;  %v628_v34 = vld [vmem:[%s1738_s11 + $0x8] sm:$0xff] }
 0x1f1   :  { %672 = vmatpush.msra.mxu0 %v629_v33  ;;  %v799_v33 = vld [vmem:[%s1742_s13 + $0xf0] sm:$0xff]  ;;  %854 = vmatpush.msrb.mxu3 %v833_v32  ;;  %v774_v32 = vld [vmem:[%s1742_s13 + $0x28] sm:$0xff] }
 0x1f3   :  { %673 = vmatpush.msra.mxu0 %v628_v34  ;;  %v800_v34 = vld [vmem:[%s1742_s13 + $0xf8] sm:$0xff] }
 0x1f4   :  { %894 = vmatpush.msrb.mxu2 %v800_v34  ;;  %v805_v34 = vld [vmem:[%s1741_s14 + $0x18] sm:$0xff] }
 0x1f5   :  { %674 = vmatpush.msra.mxu0 %v627_v38  ;;  %v798_v38 = vld [vmem:[%s1742_s13 + $0xe8] sm:$0xff] }
 0x1f6   :  { %895 = vmatpush.msrb.mxu2 %v798_v38  ;;  %v803_v38 = vld [vmem:[%s1741_s14 + $0x8] sm:$0xff] }
 0x1f7   :  { %947 = vmatmul.msk.f32.gmra.mxu0 %vm333_vm8, %v364_v35  ;;  %950 = vmatmul.msk.f32.gmra.mxu1 %vm333_vm8, %v364_v35 }
 0x1f8   :  { %953 = vmatmul.msk.f32.gmra.mxu2 %vm333_vm8, %v336_v36  ;;  %956 = vmatmul.msk.f32.gmra.mxu3 %vm333_vm8, %v336_v36 }
 0x1f9   :  { %874 = vmatpush.msrb.mxu0 %v799_v33  ;;  %v804_v33 = vld [vmem:[%s1741_s14 + $0x10] sm:$0xff] }
 0x26c   :  { %v420_v52 = vpop.f32.mrf.mxu0  ;;  %v443_v53 = vpop.f32.mrf.mxu1 }
 0x273   :  { %v478_v58 = vpop.f32.mrf.mxu2  ;;  %v501_v59 = vpop.f32.mrf.mxu3 }
 0x274   :  { %v479_v61 = vadd.f32 %v478_v58, %v420_v52  ;;  %v502_v62 = vadd.f32 %v501_v59, %v443_v53  ;;  %v423_v8 = vpop.f32.mrf.mxu0  ;;  %v446_v9 = vpop.f32.mrf.mxu1 }
 0x276   :  { %v1454_v1 = vadd.f32 %v509_v55, %v479_v61  ;;  %v1456_v2 = vadd.f32 %v510_v56, %v502_v62 }
 0x278   :  { %v957_v5 = vmul.f32 -1.442695, %v1454_v1  ;;  %v958_v6 = vmul.f32 -1.442695, %v1456_v2 }
 0x27a   :  { %986 = vpow2.f32 %v957_v5 }
 0x27b   :  { %988 = vpow2.f32 %v958_v6  ;;  %v481_v11 = vpop.f32.mrf.mxu2  ;;  %v504_v12 = vpop.f32.mrf.mxu3 }
 0x27c   :  { %v482_v14 = vadd.f32 %v481_v11, %v423_v8  ;;  %v505_v15 = vadd.f32 %v504_v12, %v446_v9 }
 0x27e   :  { %v1478_v17 = vadd.f32 %v509_v55, %v482_v14  ;;  %v1480_v18 = vadd.f32 %v510_v56, %v505_v15 }
 0x280   :  { %v987_v21 = vpop.eup %986  ;;  %v959_v22 = vmul.f32 -1.442695, %v1478_v17  ;;  %v960_v26 = vmul.f32 -1.442695, %v1480_v18 }
 0x281   :  { %v989_v24 = vpop.eup %988  ;;  %v529_v25 = vadd.f32 1.0, %v987_v21 }
 0x282   :  { %v530_v30 = vadd.f32 1.0, %v989_v24  ;;  %990 = vpow2.f32 %v959_v22 }
 0x283   :  { %992 = vrcp.f32 %v529_v25  ;;  %v542_v45 = vand.u32 2147483647, %v529_v25  ;;  %v544_v46 = vand.u32 2147483648, %v529_v25  ;;  %vm538_vm11 = vweird.f32 %v529_v25 }
 0x284   :  { %994 = vrcp.f32 %v530_v30  ;;  %v559_v49 = vand.u32 2147483648, %v530_v30  ;;  %v557_v51 = vand.u32 2147483647, %v530_v30  ;;  %vm553_vm13 = vweird.f32 %v530_v30 }
 0x285   :  { %996 = vpow2.f32 %v960_v26  ;;  %v545_v54 = vor.u32 1.1754944e-38, %v544_v46  ;;  %vm543_vm14 = vcmp.eq.f32.partialorder %v542_v45, 8.507059e+37  ;;  %v793_v45 = vld [vmem:[%s1742_s13 + $0xc0] sm:$0xff]  ;;  %v794_v46 = vld [vmem:[%s1742_s13 + $0xc8] sm:$0xff] }
 0x286   :  { %v560_v57 = vor.u32 1.1754944e-38, %v559_v49  ;;  %vm558_vm0 = vcmp.eq.f32.partialorder %v557_v51, 8.507059e+37  ;;  %v791_v49 = vld [vmem:[%s1742_s13 + $0xb0] sm:$0xff]  ;;  %v822_v51 = vld [vmem:[%s1741_s14 + $0xa0] sm:$0xff] }
 0x288   :  { %v991_v35 = vpop.eup %990 }
 0x289   :  { %v993_v36 = vpop.eup %992  ;;  %v531_v37 = vadd.f32 1.0, %v991_v35  ;;  %v830_v35 = vld [vmem:[%s1741_s14 + $0xe0] sm:$0xff] }
 0x28a   :  { %v995_v39 = vpop.eup %994  ;;  %v534_v40 = vmul.f32 %v993_v36, %v529_v25  ;;  %vm539_vm9 = vweird.f32 %v993_v36 }
 0x28b   :  { %v997_v41 = vpop.eup %996  ;;  %v549_v42 = vmul.f32 %v995_v39, %v530_v30  ;;  %998 = vrcp.f32 %v531_v37  ;;  %vm554_vm10 = vweird.f32 %v995_v39  ;;  %vm540_vm12 = vmor %vm538_vm11, %vm539_vm9  ;;  %v574_v4 = vand.u32 2147483648, %v531_v37 }
 0x28c   :  { %v535_v43 = vsub.f32 1.0, %v534_v40  ;;  %v532_v44 = vadd.f32 1.0, %v997_v41  ;;  %vm555_vm15 = vmor %vm553_vm13, %vm554_vm10  ;;  %v572_v7 = vand.u32 2147483647, %v531_v37  ;;  %vm568_vm4 = vweird.f32 %v531_v37  ;;  %v829_v40 = vld [vmem:[%s1741_s14 + $0xd8] sm:$0xff]  ;;  %v795_v41 = vld [vmem:[%s1742_s13 + $0xd0] sm:$0xff] }
 0x28d   :  { %v550_v47 = vsub.f32 1.0, %v549_v42  ;;  %vm601_vm10 = vcmask 122880   ;;  %vm649_vm11 = vcmask 1046528   ;;  %v796_v42 = vld [vmem:[%s1742_s13 + $0xd8] sm:$0xff] }
 0x28e   :  { %v536_v48 = vmul.f32 %v993_v36, %v535_v43  ;;  %1000 = vrcp.f32 %v532_v44  ;;  %v589_v10 = vand.u32 2147483648, %v532_v44  ;;  %v587_v12 = vand.u32 2147483647, %v532_v44  ;;  %896 = vmatpush.msrb.mxu2 %v796_v42  ;;  %v826_v43 = vld [vmem:[%s1741_s14 + $0xc0] sm:$0xff] }
 0x28f   :  { %v551_v50 = vmul.f32 %v995_v39, %v550_v47  ;;  %vm573_vm6 = vcmp.eq.f32.partialorder %v572_v7, 8.507059e+37  ;;  %vm583_vm7 = vweird.f32 %v532_v44  ;;  %v824_v47 = vld [vmem:[%s1741_s14 + $0xb0] sm:$0xff]  ;;  %v784_v7 = vld [vmem:[%s1742_s13 + $0x78] sm:$0xff] }
 0x290   :  { %v537_v52 = vadd.f32 %v993_v36, %v536_v48  ;;  %v590_v16 = vor.u32 1.1754944e-38, %v589_v10  ;;  %vm588_vm9 = vcmp.eq.f32.partialorder %v587_v12, 8.507059e+37  ;;  %897 = vmatpush.msrb.mxu2 %v794_v46  ;;  %v825_v48 = vld [vmem:[%s1741_s14 + $0xb8] sm:$0xff]  ;;  %v815_v10 = vld [vmem:[%s1741_s14 + $0x68] sm:$0xff]  ;;  %v973_v12 = vld [vmem:[%s1740_s12] ss:$0 sm:$0xff] }
 0x291   :  { %v999_v53 = vpop.eup %998  ;;  %v552_v55 = vadd.f32 %v995_v39, %v551_v50  ;;  %v792_v50 = vld [vmem:[%s1742_s13 + $0xb8] sm:$0xff] }
 0x292   :  { %v541_v56 = vsel %vm540_vm12, %v993_v36, %v537_v52  ;;  %v564_v58 = vmul.f32 %v999_v53, %v531_v37  ;;  %vm569_vm2 = vweird.f32 %v999_v53  ;;  %v831_v36 = vld [vmem:[%s1741_s14 + $0xe8] sm:$0xff]  ;;  %v797_v37 = vld [vmem:[%s1742_s13 + $0xe0] sm:$0xff]  ;;  %898 = vmatpush.msrb.mxu2 %v792_v50 }
 0x293   :  { %v546_v59 = vsel %vm543_vm14, %v545_v54, %v541_v56  ;;  %v556_v60 = vsel %vm555_vm15, %v995_v39, %v552_v55  ;;  %vm570_vm3 = vmor %vm568_vm4, %vm569_vm2  ;;  %855 = vmatpush.msrb.mxu3 %v831_v36  ;;  %875 = vmatpush.msrb.mxu0 %v797_v37  ;;  %v828_v39 = vld [vmem:[%s1741_s14 + $0xd0] sm:$0xff]  ;;  %v823_v52 = vld [vmem:[%s1741_s14 + $0xa8] sm:$0xff] }
 0x294   :  { %v1001_v61 = vpop.eup %1000  ;;  %v593_v62 = vmul.f32 %v546_v59, %v1454_v1  ;;  %v561_v63 = vsel %vm558_vm0, %v560_v57, %v556_v60  ;;  %v565_v0 = vsub.f32 1.0, %v564_v58  ;;  %v575_v1 = vor.u32 1.1754944e-38, %v574_v4  ;;  %v790_v54 = vld [vmem:[%s1742_s13 + $0xa8] sm:$0xff]  ;;  %v820_v55 = vld [vmem:[%s1741_s14 + $0x90] sm:$0xff]  ;;  %v821_v56 = vld [vmem:[%s1741_s14 + $0x98] sm:$0xff] }
 0x295   :  { %v594_v3 = vmul.f32 %v561_v63, %v1456_v2  ;;  %v579_v5 = vmul.f32 %v1001_v61, %v532_v44  ;;  %vm584_vm5 = vweird.f32 %v1001_v61  ;;  %856 = vmatpush.msrb.mxu3 %v829_v40  ;;  %876 = vmatpush.msrb.mxu0 %v795_v41  ;;  %v827_v44 = vld [vmem:[%s1741_s14 + $0xc8] sm:$0xff]  ;;  %v787_v57 = vld [vmem:[%s1742_s13 + $0x90] sm:$0xff]  ;;  %v788_v58 = vld [vmem:[%s1742_s13 + $0x98] sm:$0xff]  ;;  %vm923_vm0 = vcmask 784384  }
 0x296   :  { %597 = vst [vmem:[#allocation5] sm:$0xff] %v593_v62  ;;  %v566_v6 = vmul.f32 %v999_v53, %v565_v0  ;;  %718 = vmatmul.f32.vlgmr.msra.gmra.mxu2 %v593_v62  ;;  %vm585_vm8 = vmor %vm583_vm7, %vm584_vm5  ;;  %v818_v60 = vld [vmem:[%s1741_s14 + $0x80] sm:$0xff]  ;;  %v786_v63 = vld [vmem:[%s1742_s13 + $0x88] sm:$0xff] }
 0x297   :  { %v580_v8 = vsub.f32 1.0, %v579_v5  ;;  %599 = vst.msk [vmem:[#allocation5 + $0x8] sm:$0xff] %vm598_vm1, %v594_v3  ;;  %857 = vmatpush.msrb.mxu3 %v827_v44  ;;  %877 = vmatpush.msrb.mxu0 %v793_v45  ;;  %v785_v62 = vld [vmem:[%s1742_s13 + $0x80] sm:$0xff]  ;;  %v816_v3 = vld [vmem:[%s1741_s14 + $0x70] sm:$0xff]  ;;  %v817_v4 = vld [vmem:[%s1741_s14 + $0x78] sm:$0xff] }
 0x298   :  { %v567_v9 = vadd.f32 %v999_v53, %v566_v6  ;;  %899 = vmatpush.msrb.mxu2 %v790_v54  ;;  %v783_v5 = vld [vmem:[%s1742_s13 + $0x70] sm:$0xff]  ;;  %v772_v36 = vld [vmem:[%s1742_s13 + $0x18] sm:$0xff]  ;;  %v802_v37 = vld [vmem:[%s1741_s14] sm:$0xff] }
 0x299   :  { %v581_v11 = vmul.f32 %v1001_v61, %v580_v8  ;;  %858 = vmatpush.msrb.mxu3 %v825_v48  ;;  %878 = vmatpush.msrb.mxu0 %v791_v49  ;;  %v770_v40 = vld [vmem:[%s1742_s13 + $0x8] sm:$0xff] }
 0x29a   :  { %v571_v13 = vsel %vm570_vm3, %v999_v53, %v567_v9  ;;  %v789_v53 = vld [vmem:[%s1742_s13 + $0xa0] sm:$0xff]  ;;  %900 = vmatpush.msrb.mxu2 %v788_v58 }
 0x29b   :  { %v576_v2 = vsel %vm573_vm6, %v575_v1, %v571_v13  ;;  %v582_v14 = vadd.f32 %v1001_v61, %v581_v11  ;;  %859 = vmatpush.msrb.mxu3 %v823_v52  ;;  %879 = vmatpush.msrb.mxu0 %v789_v53  ;;  %v814_v9 = vld [vmem:[%s1741_s14 + $0x60] sm:$0xff]  ;;  %v782_v13 = vld [vmem:[%s1742_s13 + $0x68] sm:$0xff] }
 0x29c   :  { %v595_v15 = vmul.f32 %v576_v2, %v1478_v17  ;;  %901 = vmatpush.msrb.mxu2 %v786_v63  ;;  %v781_v1 = vld [vmem:[%s1742_s13 + $0x60] sm:$0xff] }
 0x29d   :  { %v586_v19 = vsel %vm585_vm8, %v1001_v61, %v582_v14  ;;  %v623_v23 = vld [vmem:[#allocation5] sm:$0xfe]  ;;  %860 = vmatpush.msrb.mxu3 %v821_v56  ;;  %880 = vmatpush.msrb.mxu0 %v787_v57  ;;  %v819_v61 = vld [vmem:[%s1741_s14 + $0x88] sm:$0xff]  ;;  %v914_v56 = vld [vmem:[%s1743_s15] sm:$0x3] }
 0x29e   :  { %600 = vst [vmem:[#allocation5 + $0x10] sm:$0x1] %v595_v15  ;;  %v591_v20 = vsel %vm588_vm9, %v590_v16, %v586_v19  ;;  %v604_v21 = vld [vmem:[#allocation5 + $0x8] sm:$0xff]  ;;  %v650_v25 = vrot.slane %v623_v23, 1  ;;  %902 = vmatpush.msrb.mxu2 %v784_v7  ;;  %v812_v14 = vld [vmem:[%s1741_s14 + $0x50] sm:$0xff]  ;;  %v777_v23 = vld [vmem:[%s1742_s13 + $0x40] sm:$0xff] }
 0x29f   :  { %v596_v22 = vmul.f32 %v591_v20, %v1480_v18  ;;  %962 = vmatmul.msk.f32.vlgmr.msra.gmra.mxu3 %vm598_vm1, %v604_v21  ;;  %v624_v27 = vld [vmem:[#allocation5 + $0x8] sm:$0xfe]  ;;  %v832_v18 = vld [vmem:[%s1741_s14 + $0xf0] sm:$0xff]  ;;  %881 = vmatpush.msrb.mxu0 %v785_v62  ;;  %v810_v21 = vld [vmem:[%s1741_s14 + $0x40] sm:$0xff]  ;;  %v916_v58 = vperm.slane %v914_v56, 0  ;;  %v917_v63 = vperm.slane %v914_v56, 1 }
 0x2a0   :  { %v653_v29 = vrot.slane %v624_v27, 1  ;;  %834 = vmatpush.msrb.mxu1 %v832_v18  ;;  %861 = vmatpush.msrb.mxu3 %v819_v61  ;;  %v813_v15 = vld [vmem:[%s1741_s14 + $0x58] sm:$0xff]  ;;  %v779_v16 = vld [vmem:[%s1742_s13 + $0x50] sm:$0xff]  ;;  %v773_v18 = vld [vmem:[%s1742_s13 + $0x20] sm:$0xff] }
 0x2a1   :  { %602 = vst.msk [vmem:[#allocation5 + $0x18] sm:$0x1] %vm601_vm10, %v596_v22  ;;  %882 = vmatpush.msrb.mxu0 %v783_v5  ;;  %903 = vmatpush.msrb.mxu2 %v782_v13  ;;  %v780_v20 = vld [vmem:[%s1742_s13 + $0x58] sm:$0xff]  ;;  %v811_v22 = vld [vmem:[%s1741_s14 + $0x48] sm:$0xff] }
 0x2a2   :  { %835 = vmatpush.msrb.mxu1 %v830_v35  ;;  %862 = vmatpush.msrb.mxu3 %v817_v4  ;;  %v809_v27 = vld [vmem:[%s1741_s14 + $0x38] sm:$0xff]  ;;  %v771_v35 = vld [vmem:[%s1742_s13 + $0x10] sm:$0xff] }
 0x2a3   :  { %883 = vmatpush.msrb.mxu0 %v781_v1  ;;  %904 = vmatpush.msrb.mxu2 %v780_v20 }
 0x2a4   :  { %836 = vmatpush.msrb.mxu1 %v828_v39  ;;  %863 = vmatpush.msrb.mxu3 %v815_v10  ;;  %v769_v39 = vld [vmem:[%s1742_s13] sm:$0xff] }
 0x2a5   :  { %v625_v24 = vld [vmem:[#allocation5 + $0x10] sm:$0x1]  ;;  %884 = vmatpush.msrb.mxu0 %v779_v16 }
 0x2a6   :  { %v651_v26 = vrot.slane %v625_v24, 1  ;;  %837 = vmatpush.msrb.mxu1 %v826_v43  ;;  %864 = vmatpush.msrb.mxu3 %v813_v15 }
 0x2a7   :  { %885 = vmatpush.msrb.mxu0 %v777_v23 }
 0x2a8   :  { %v652_v17 = vsel %vm649_vm11, %v650_v25, %v651_v26  ;;  %v626_v28 = vld [vmem:[#allocation5 + $0x18] sm:$0x1]  ;;  %838 = vmatpush.msrb.mxu1 %v824_v47  ;;  %865 = vmatpush.msrb.mxu3 %v811_v22  ;;  %v808_v26 = vld [vmem:[%s1741_s14 + $0x30] sm:$0xff] }
 0x2a9   :  { %675 = vmatmul.f32.vlgmr.msra.gmra.mxu0 %v652_v17  ;;  %v654_v30 = vrot.slane %v626_v28, 1  ;;  %v778_v25 = vld [vmem:[%s1742_s13 + $0x48] sm:$0xff]  ;;  %v775_v17 = vld [vmem:[%s1742_s13 + $0x30] sm:$0xff]  ;;  %v776_v28 = vld [vmem:[%s1742_s13 + $0x38] sm:$0xff] }
 0x2aa   :  { %839 = vmatpush.msrb.mxu1 %v822_v51  ;;  %905 = vmatpush.msrb.mxu2 %v778_v25 }
 0x2ab   :  { %v655_v31 = vsel %vm649_vm11, %v653_v29, %v654_v30  ;;  %v806_v29 = vld [vmem:[%s1741_s14 + $0x20] sm:$0xff]  ;;  %866 = vmatpush.msrb.mxu3 %v809_v27  ;;  %886 = vmatpush.msrb.mxu0 %v775_v17 }
 0x2ac   :  { %961 = vmatmul.msk.f32.vlgmr.msra.gmra.mxu1 %vm598_vm1, %v655_v31  ;;  %v807_v31 = vld [vmem:[%s1741_s14 + $0x28] sm:$0xff]  ;;  %906 = vmatpush.msrb.mxu2 %v776_v28 }
 0x2ad   :  { %840 = vmatpush.msrb.mxu1 %v820_v55  ;;  %867 = vmatpush.msrb.mxu3 %v807_v31 }
 0x2ae   :  { %887 = vmatpush.msrb.mxu0 %v773_v18  ;;  %907 = vmatpush.msrb.mxu2 %v774_v32 }
 0x2af   :  { %841 = vmatpush.msrb.mxu1 %v818_v60  ;;  %868 = vmatpush.msrb.mxu3 %v805_v34 }
 0x2b0   :  { %888 = vmatpush.msrb.mxu0 %v771_v35  ;;  %908 = vmatpush.msrb.mxu2 %v772_v36 }
 0x2b1   :  { %842 = vmatpush.msrb.mxu1 %v816_v3  ;;  %869 = vmatpush.msrb.mxu3 %v803_v38 }
 0x2b2   :  { %889 = vmatpush.msrb.mxu0 %v769_v39  ;;  %909 = vmatpush.msrb.mxu2 %v770_v40 }
 0x2b3   :  { %843 = vmatpush.msrb.mxu1 %v814_v9 }
 0x2b5   :  { %844 = vmatpush.msrb.mxu1 %v812_v14 }
 0x2b7   :  { %845 = vmatpush.msrb.mxu1 %v810_v21 }
 0x2b9   :  { %846 = vmatpush.msrb.mxu1 %v808_v26 }
 0x2bb   :  { %847 = vmatpush.msrb.mxu1 %v806_v29 }
 0x2bd   :  { %848 = vmatpush.msrb.mxu1 %v804_v33 }
 0x2bf   :  { %849 = vmatpush.msrb.mxu1 %v802_v37 }
 0x319   :  { %v719_v8 = vpop.f32.mrf.mxu2 }
 0x322   :  { %v739_v2 = vpop.f32.mrf.mxu3 }
 0x326   :  { %v676_v59 = vpop.f32.mrf.mxu0 }
 0x329   :  { %v696_v0 = vpop.f32.mrf.mxu1 }
 0x32a   :  { %v697_v6 = vadd.f32 %v696_v0, %v676_v59 }
 0x32c   :  { %v720_v11 = vadd.f32 %v719_v8, %v697_v6 }
 0x32e   :  { %v740_v19 = vadd.f32 %v739_v2, %v720_v11 }
 0x330   :  { %v746_v24 = vadd.f32 %v973_v12, %v740_v19 }
 0x332   :  { %v963_v30 = vmul.f32 -1.442695, %v746_v24 }
 0x334   :  { %1002 = vpow2.f32 %v963_v30 }
 0x33a   :  { %v1003_v41 = vpop.eup %1002 }
 0x33b   :  { %v750_v42 = vadd.f32 1.0, %v1003_v41 }
 0x33d   :  { %1004 = vrcp.f32 %v750_v42  ;;  %v762_v46 = vand.u32 2147483648, %v750_v42  ;;  %v760_v48 = vand.u32 2147483647, %v750_v42  ;;  %vm756_vm13 = vweird.f32 %v750_v42 }
 0x33f   :  { %v763_v50 = vor.u32 1.1754944e-38, %v762_v46  ;;  %vm761_vm15 = vcmp.eq.f32.partialorder %v760_v48, 8.507059e+37 }
 0x343   :  { %v1005_v43 = vpop.eup %1004 }
 0x344   :  { %v752_v44 = vmul.f32 %v1005_v43, %v750_v42  ;;  %vm757_vm12 = vweird.f32 %v1005_v43 }
 0x345   :  { %vm758_vm14 = vmor %vm756_vm13, %vm757_vm12 }
 0x346   :  { %v753_v45 = vsub.f32 1.0, %v752_v44 }
 0x348   :  { %v754_v47 = vmul.f32 %v1005_v43, %v753_v45 }
 0x34a   :  { %v755_v49 = vadd.f32 %v1005_v43, %v754_v47 }
 0x34c   :  { %v759_v51 = vsel %vm758_vm14, %v1005_v43, %v755_v49 }
 0x34d   :  { %v764_v52 = vsel %vm761_vm15, %v763_v50, %v759_v51 }
 0x34e   :  { %v766_v53 = vmul.f32 %v764_v52, %v746_v24 }
 0x350   :  { %767 = vst [vmem:[#allocation6] sm:$0xff] %v766_v53 }
 0x357   :  { %v801_v54 = vld [vmem:[#allocation6 + $0x1] sm:$0x7f] }
 0x358   :  { %v768_v55 = vld [vmem:[#allocation6] sm:$0x7f]  ;;  %850 = vmatmul.f32.vlgmr.msrb.gmra.mxu1 %v801_v54  ;;  %870 = vmatmul.f32.vlgmr.msrb.gmra.mxu3 %v801_v54 }
 0x359   :  { %890 = vmatmul.f32.vlgmr.msrb.gmra.mxu0 %v768_v55  ;;  %910 = vmatmul.f32.vlgmr.msrb.gmra.mxu2 %v768_v55 }
 0x3d5   :  { %v851_v57 = vpop.f32.mrf.mxu1 }
 0x3d6   :  { %v891_v59 = vpop.f32.mrf.mxu0 }
 0x3d7   :  { %v892_v60 = vadd.f32 %v891_v59, %v851_v57 }
 0x3d9   :  { %v920_v61 = vadd.f32 %v916_v58, %v892_v60 }
 0x3db   :  { %922 = vst [vmem:[%s1744_s16] sm:$0x7f] %v920_v61  ;;  %v871_v62 = vpop.f32.mrf.mxu3 }
 0x3dc   :  { %v911_v0 = vpop.f32.mrf.mxu2 }
 0x3dd   :  { %v912_v3 = vadd.f32 %v911_v0, %v871_v62 }
 0x3df   :  { %v921_v4 = vadd.f32 %v917_v63, %v912_v3 }
 0x3e1   :  { %924 = vst.msk [vmem:[%s1744_s16 + $0x8] sm:$0x7f] %vm923_vm0, %v921_v4 }

</bundles_post_ra>
